<compile_context>
chip_gen: v5e
topology: v5e:2x2
jax: 0.10.0
libtpu: 0.0.40
codegen_flags: <defaults>
</compile_context>

<pallas_src>
import functools

import jax
import jax.numpy as jnp
from jax.experimental import pallas as pl
from jax.experimental.pallas import tpu as pltpu

_LANE = 128


def _normalize_kernel(x_ref, o_ref, *, power, channels):
    # Block: (1, C, TILE_HW). The channel reduction is fully contained in the
    # block; the spatial tile sits on the lane axis.
    x = x_ref[...]
    # Only upcast when the stored dtype is sub-32-bit; memory tiles stay in
    # the native dtype so HBM traffic is unchanged.
    xf = x.astype(jnp.float32) if x.dtype != jnp.float32 else x

    if power == 2:
        sq = xf * xf
        if channels <= 8:
            # Small channel count: unrolled lane-wise adds (VPU) instead of a
            # cross-sublane XLU reduction over a half-empty vreg.
            acc = sq[:, 0:1, :]
            for c in range(1, channels):
                acc = acc + sq[:, c:c + 1, :]
            sum_sq = acc
        else:
            sum_sq = jnp.sum(sq, axis=1, keepdims=True)
        norm = jnp.sqrt(sum_sq)
    else:
        # Generic power path (matches torch for arbitrary self.power).
        norm = jnp.sum(xf ** power, axis=1, keepdims=True) ** (1.0 / power)

    # torch semantics: out = x / (norm + 1e-7)  (eps added to the NORM, not to
    # the sum of squares). One reciprocal per pixel + broadcast multiply
    # instead of C x HW divides. approx=False keeps it within 1e-5 of divide.
    inv = pl.reciprocal(norm + 1e-07, approx=False)
    o_ref[...] = (xf * inv).astype(o_ref.dtype)


def normalize(x, power=2, tile_hw=None, vmem_budget_bytes=8 * 1024 * 1024):
    """Pallas implementation of cutGAN Normalize.forward for NCHW inputs."""
    B, C, H, W = x.shape
    HW = H * W
    x2 = x.reshape(B, C, HW)

    # Pad the lane (spatial) dim to a multiple of 128 so output stores are
    # unmasked, full-width vst (masked partial stores are ~4x slower).
    HW_pad = ((HW + _LANE - 1) // _LANE) * _LANE
    if HW_pad != HW:
        x2 = jnp.pad(x2, ((0, 0), (0, 0), (0, HW_pad - HW)))

    itemsize = jnp.dtype(x.dtype).itemsize
    if tile_hw is None:
        # Keep 2x(input) + 2x(output) double buffers under a conservative
        # budget so the same tiling fits v7x's smaller (64 MiB) VMEM as well
        # as v5e/v6e. TILE_HW is a multiple of 128 that divides HW_pad.
        max_tile = max(_LANE, vmem_budget_bytes // (4 * C * itemsize))
        max_tile = max(_LANE, (max_tile // _LANE) * _LANE)
        tile_hw = min(HW_pad, max_tile)
        while HW_pad % tile_hw != 0:
            tile_hw -= _LANE
    assert tile_hw % _LANE == 0 and HW_pad % tile_hw == 0

    grid = (B, HW_pad // tile_hw)

    kernel = functools.partial(_normalize_kernel, power=power, channels=C)

    # Advisory hint for XLA's scheduler: cheap, memory-bound op.
    cost = pl.CostEstimate(
        flops=3 * B * C * HW_pad,
        transcendentals=2 * B * HW_pad,
        bytes_accessed=2 * B * C * HW_pad * itemsize,
    )

    out = pl.pallas_call(
        kernel,
        out_shape=jax.ShapeDtypeStruct((B, C, HW_pad), x.dtype),
        grid_spec=pltpu.PrefetchScalarGridSpec(
            num_scalar_prefetch=0,
            grid=grid,
            in_specs=[pl.BlockSpec((1, C, tile_hw), lambda b, s: (b, 0, s))],
            out_specs=pl.BlockSpec((1, C, tile_hw), lambda b, s: (b, 0, s)),
        ),
        compiler_params=pltpu.CompilerParams(
            dimension_semantics=("parallel", "parallel"),
        ),
        cost_estimate=cost,
    )(x2)

    if HW_pad != HW:
        out = out[:, :, :HW]
    return out.reshape(B, C, H, W)


if __name__ == "__main__":
    key = jax.random.PRNGKey(0)
    B, C, H, W = 2, 4, 16, 16
    x = jax.random.normal(key, (B, C, H, W), dtype=jnp.float32)

    out = normalize(x, power=2)
    out = jax.block_until_ready(out)

    # Pure-JAX reference check (same math as the torch module).
    norm_ref = jnp.power(jnp.sum(jnp.power(x, 2), axis=1, keepdims=True), 0.5)
    ref = x / (norm_ref + 1e-07)
    assert out.shape == x.shape and out.dtype == x.dtype
    assert jnp.allclose(out, ref, atol=1e-5, rtol=1e-5)

    print("KERNEL_OK")
</pallas_src>

<mosaic_0001>
module attributes {stable_mosaic.version = 11 : i64} {
  func.func @_normalize_kernel(%arg0: i32, %arg1: i32, %arg2: memref<1x4x256xf32, #tpu.memory_space<vmem>>, %arg3: memref<1x4x256xf32, #tpu.memory_space<vmem>>) attributes {dimension_semantics = [#tpu.dimension_semantics<parallel>, #tpu.dimension_semantics<parallel>], iteration_bounds = array<i64: 2, 1>, scalar_prefetch = 0 : i64, scratch_operands = 0 : i64, tpu.core_type = #tpu.core_type<tc>, window_params = [{transform_indices = @transform_0, window_bounds = array<i64: 1, 4, 256>}, {transform_indices = @transform_1, window_bounds = array<i64: 1, 4, 256>}]} {
    %c0 = arith.constant 0 : index
    %c0_0 = arith.constant 0 : index
    %c0_1 = arith.constant 0 : index
    %0 = vector.load %arg2[%c0, %c0_0, %c0_1] : memref<1x4x256xf32, #tpu.memory_space<vmem>>, vector<1x4x256xf32>
    %1 = arith.mulf %0, %0 : vector<1x4x256xf32>
    %2 = vector.extract_strided_slice %1 {offsets = [0, 0, 0], sizes = [1, 1, 256], strides = [1, 1, 1]} : vector<1x4x256xf32> to vector<1x1x256xf32>
    %3 = vector.extract_strided_slice %1 {offsets = [0, 1, 0], sizes = [1, 1, 256], strides = [1, 1, 1]} : vector<1x4x256xf32> to vector<1x1x256xf32>
    %4 = arith.addf %2, %3 : vector<1x1x256xf32>
    %5 = vector.extract_strided_slice %1 {offsets = [0, 2, 0], sizes = [1, 1, 256], strides = [1, 1, 1]} : vector<1x4x256xf32> to vector<1x1x256xf32>
    %6 = arith.addf %4, %5 : vector<1x1x256xf32>
    %7 = vector.extract_strided_slice %1 {offsets = [0, 3, 0], sizes = [1, 1, 256], strides = [1, 1, 1]} : vector<1x4x256xf32> to vector<1x1x256xf32>
    %8 = arith.addf %6, %7 : vector<1x1x256xf32>
    %9 = math.sqrt %8 : vector<1x1x256xf32>
    %cst = arith.constant 1.000000e-07 : f32
    %10 = vector.broadcast %cst : f32 to vector<1x1x256xf32>
    %11 = arith.addf %9, %10 : vector<1x1x256xf32>
    %12 = tpu.reciprocal %11 : vector<1x1x256xf32> -> vector<1x1x256xf32>
    %13 = vector.broadcast %12 : vector<1x1x256xf32> to vector<1x4x256xf32>
    %14 = arith.mulf %0, %13 : vector<1x4x256xf32>
    %c0_2 = arith.constant 0 : index
    %c0_3 = arith.constant 0 : index
    %c0_4 = arith.constant 0 : index
    %15 = vector.load %arg3[%c0_2, %c0_3, %c0_4] : memref<1x4x256xf32, #tpu.memory_space<vmem>>, vector<1x4x256xf32>
    tpu.vector_store %arg3[%c0_2, %c0_3, %c0_4], %14 {strides = array<i32>} : memref<1x4x256xf32, #tpu.memory_space<vmem>>, vector<1x4x256xf32>,
    return
  }
  func.func @transform_0(%arg0: i32, %arg1: i32) -> (i32, i32, i32) {
    %c0_i32 = arith.constant 0 : i32
    %c0_i32_0 = arith.constant 0 : i32
    return %arg0, %c0_i32, %arg1 : i32, i32, i32
  }
  func.func @transform_1(%arg0: i32, %arg1: i32) -> (i32, i32, i32) {
    %c0_i32 = arith.constant 0 : i32
    %c0_i32_0 = arith.constant 0 : i32
    return %arg0, %c0_i32, %arg1 : i32, i32, i32
  }
}

</mosaic_0001>

<bundles_post_ra>
// kernel: tpu_custom_call.1
= control target key start
LH: loop header
LB: loop body
LE: loop exit
PB: predicated region body
PF: predicated region fallthrough
CT: control target
= control target key end

     0   :  { %6 = vsyncpa [#allocation3], 0  ;;  %s649_s0 = inlined_call_operand.hbm [shape: f32[2,4,256], index: 0, kind: input, shape index: {}]   ;;  %s650_s1 = inlined_call_operand.hbm [shape: f32[2,4,256], index: 1, kind: output, shape index: {}]  }
   0x1   :  { %8 = vsyncpa [#allocation3 + $0x1], 0 }
   0x2   :  { %9 = vsyncpa [#allocation4], 0 }
   0x3   :  { %11 = vsyncpa [#allocation4 + $0x1], 0  ;;  %s525_s6 = smov 0   ;;  %s527_s7 = smov 0  }
   0x4   :  { %s529_s8 = smov 0   ;;  %s531_s9 = smov 0  }
   0x5   :  { %s533_s10 = smov 0   ;;  %s535_s11 = smov 0  }
   0x6 LB: > { %s315_s12 = sadd.s32 4294967295, %s513_s11   ;;  %s316_s13 = sadd.s32 4294967294, %s513_s11   ;;  %s513_s11 = sphi %s535_s11, %s17_s11   ;;  %s509_s10 = sphi %s533_s10, %s659_s10   ;;  %s505_s9 = sphi %s531_s9, %s658_s9   ;;  %s501_s8 = sphi %s529_s8, %s657_s8   ;;  %s497_s7 = sphi %s527_s7, %s656_s7   ;;  %s493_s6 = sphi %s525_s6, %s655_s6  }
   0x7   : > { %s29_s14 = sadd.s32 1, %s509_s10  ;;  %s38_s15 = sadd.s32 1, %s501_s8 }
   0x8   : > { %p31_p0 = scmp.ge.s32.totalorder %s29_s14, 2  ;;  %p45_p1 = scmp.ne.s32.totalorder %s501_s8, %s497_s7 }
   0x9   : > { %p46_p2 = scmp.eq.s32.totalorder %s513_s11, 0  ;;  %p51_p3 = scmp.ne.s32.totalorder %s497_s7, %s493_s6 }
   0xa   : > { %s661_s14 = smov (%p31_p0, %s29_s14), 0  ;;  %p52_p5 = scmp.eq.s32.totalorder %s315_s12, 0 }
   0xb   : > { %p566_p4 = por %p46_p2, %p45_p1  ;;  %s33_s17 = ssub.s32 %s509_s10, %s661_s14 }
   0xc   : > { %p77_p6 = scmp.eq.s32.totalorder %s315_s12, 1  ;;  %p36_p7 = scmp.eq.s32.totalorder %s33_s17, 0 }
   0xd   : > { %p572_p8 = por %p52_p5, %p51_p3  ;;  %p83_p10 = scmp.eq.s32.totalorder %s316_s13, 1 }
   0xe   : > { %p576_p9 = por %p77_p6, %p45_p1  ;;  %p318_p12 = scmp.ge.s32.totalorder %s513_s11, 2 }
   0xf   : > { %s581_s20 = scalar_select %p36_p7, %s501_s8, %s38_s15  }
  0x10   : > { %p583_p11 = por %p83_p10, %p51_p3  ;;  %p347_p13 = scmp.lt.s32.totalorder %s513_s11, 2 }
  0x11   : > { %s103_s22 = sand.u32 1, %s501_s8   ;;  %s333_s24 = sshll.u32 %s509_s10, 3 }
  0x12   : > { %s319_s23 = sshll.u32 %s103_s22, 3  ;;  %s114_s27 = scalar_lea.hbm %s649_s0, %s333_s24 }
  0x13   : > { %s107_s28 = scalar_lea.vmem [#allocation2], %s319_s23  ;;  %s116_s30 = sshll.u32 %s114_s27, 4  ;;  %s117_s30 = int_to_ptr.hbm [resolvable:$true] %s116_s30 }
  0x14   : > { %s118_s29 = sshll.u32 %s107_s28, 4  ;;  %p340_p0 = pnand %p347_p13, %p566_p4  ;;  %s119_s29 = int_to_ptr.vmem [resolvable:$true] %s118_s29 }
  0x15   : > { %p322_p1 = scmp.ge.s32.totalorder %s513_s11, 1  ;;  %p123_p2 = scmp.lt.s32.totalorder %s513_s11, 3 }
  0x16   : > { %s104_s2 = scalar_lea.sflag [#allocation3], %s103_s22 }
  0x17   : > { %342 = dma.hbm_to_vmem [thread:$0]  (!%p340_p0), %s117_s30, 128, %s119_s29, %s104_s2  }
  0x18   : > { %p124_p3 = pnand %p322_p1, %p123_p2 }
  0x19   : > { %s599_s3 = sand.u32 (!%p124_p3), 1, %s497_s7  }
  0x1a   : > { %127 = sbr.rel (%p124_p3) target bundleno = 95 (0x5f), region = 24  ;;  %s323_s4 = sshll.u32 (!%p124_p3), %s599_s3, 3 }
  0x1b   : > { %s130_s5 = scalar_lea.sflag (!%p124_p3), [#allocation3], %s599_s3  ;;  %s133_s12 = scalar_lea.vmem (!%p124_p3), [#allocation2], %s323_s4 }
  0x1f   : > { %484 = dma.done.wait (%p572_p8), %s130_s5, 128  }
  0x20   : > { %486 = vsyncadd (%p572_p8), %s130_s5, 4294967168  ;;  %v155_v0 = vld [vmem:[%s133_s12] sm:$0xff]  ;;  %s334_s13 = sshll.u32 %s505_s9, 3  ;;  %vm207_vm6 = vcmask 1043456   ;;  %s152_s18 = scalar_lea.vmem [#allocation5], %s323_s4 }
  0x21   : > { %v156_v1 = vmul.f32 %v155_v0, %v155_v0  ;;  %s226_s17 = scalar_lea.hbm %s650_s1, %s334_s13  ;;  %s228_s22 = sshll.u32 %s152_s18, 4  ;;  %s229_s22 = int_to_ptr.vmem [resolvable:$true] %s228_s22 }
  0x22   : > { %s230_s23 = sshll.u32 %s226_s17, 4  ;;  %s213_s9 = scalar_lea.sflag [#allocation4], %s599_s3  ;;  %s231_s23 = int_to_ptr.hbm [resolvable:$true] %s230_s23 }
  0x23   : > { %v325_v2 = vrot.slane %v156_v1, 9  ;;  %v326_v3 = vrot.slane %v156_v1, 10  ;;  %v327_v5 = vrot.slane %v156_v1, 11  ;;  %s445_s24 = sshra.s32 %s231_s23, 4  ;;  %s451_s28 = scalar_lea.hbm %s650_s1, 16  ;;  %s446_s24 = int_to_ptr.hbm [resolvable:$true] %s445_s24 }
  0x24   : > { %s447_s25 = scalar_lea.hbm %s446_s24, 8  ;;  %p452_p7 = scmp.lt.s32.totalorder %s446_s24, %s650_s1 }
  0x25   : > { %v161_v4 = vadd.f32 %v325_v2, %v156_v1  ;;  %p448_p4 = scmp.ne.s32.totalorder %s446_s24, %s447_s25  ;;  %p453_p8 = scmp.lt.s32.totalorder %s451_s28, %s447_s25 }
  0x27   : > { %v165_v6 = vadd.f32 %v326_v3, %v161_v4  ;;  %p449_p5 = pnand %p448_p4, %p576_p9  ;;  %p454_p10 = por %p453_p8, %p452_p7 }
  0x29   : > { %v169_v7 = vadd.f32 %v327_v5, %v165_v6  ;;  %p450_p6 = pneg %p449_p5 }
  0x2b   : > { %397 = vrsqrt.f32 %v169_v7  ;;  %vm177_vm0 = vcmp.eq.f32.partialorder %v169_v7, inf  ;;  %v180_v14 = vand.u32 2147483648, %v169_v7  ;;  %vm179_vm1 = vcmp.eq.f32.partialorder %v169_v7, 0.0  ;;  %p455_p13 = pnand %p454_p10, %p450_p6 }
  0x31   : > { %v398_v8 = vpop.eup %397 }
  0x32   : > { %v171_v9 = vmul.f32 %v398_v8, %v169_v7 }
  0x34   : > { %v172_v10 = vmul.f32 %v398_v8, %v171_v9 }
  0x36   : > { %v173_v11 = vmul.f32 0.5, %v172_v10 }
  0x38   : > { %v174_v12 = vsub.f32 1.5, %v173_v11 }
  0x3a   : > { %v175_v13 = vmul.f32 %v398_v8, %v174_v12 }
  0x3c   : > { %v176_v15 = vmul.f32 %v175_v13, %v169_v7 }
  0x3e   : > { %v178_v16 = vsel %vm177_vm0, %v169_v7, %v176_v15 }
  0x3f   : > { %v181_v17 = vsel %vm179_vm1, %v180_v14, %v178_v16 }
  0x40   : > { %v182_v18 = vadd.f32 1e-07, %v181_v17 }
  0x42   : > { %399 = vrcp.f32 %v182_v18  ;;  %v194_v21 = vand.u32 2147483648, %v182_v18  ;;  %vm188_vm2 = vweird.f32 %v182_v18  ;;  %v192_v23 = vand.u32 2147483647, %v182_v18 }
  0x44   : > { %v195_v25 = vor.u32 1.1754944e-38, %v194_v21  ;;  %vm193_vm5 = vcmp.eq.f32.partialorder %v192_v23, 8.507059e+37 }
  0x48   : > { %v400_v19 = vpop.eup %399 }
  0x49   : > { %v184_v20 = vmul.f32 %v400_v19, %v182_v18  ;;  %vm189_vm3 = vweird.f32 %v400_v19 }
  0x4a   : > { %vm190_vm4 = vmor %vm188_vm2, %vm189_vm3 }
  0x4b   : > { %v185_v22 = vsub.f32 1.0, %v184_v20 }
  0x4d   : > { %v186_v24 = vmul.f32 %v400_v19, %v185_v22 }
  0x4f   : > { %v187_v26 = vadd.f32 %v400_v19, %v186_v24 }
  0x51   : > { %v191_v27 = vsel %vm190_vm4, %v400_v19, %v187_v26 }
  0x52   : > { %v196_v28 = vsel %vm193_vm5, %v195_v25, %v191_v27 }
  0x53   : > { %v198_v29 = vperm.slane %v196_v28, 0  ;;  %v199_v30 = vperm.slane %v196_v28, 4 }
  0x55   : > { %v202_v31 = vperm.slane %v198_v29, 0  ;;  %v203_v32 = vperm.slane %v199_v30, 0 }
  0x57   : > { %v206_v33 = vrot.slane %v203_v32, 4 }
  0x59   : > { %v208_v34 = vsel %vm207_vm6, %v202_v31, %v206_v33 }
  0x5a   : > { %v210_v35 = vmul.f32 %v208_v34, %v155_v0 }
  0x5c   : > { %211 = vst [vmem:[%s152_s18] sm:$0xff] %v210_v35 }
  0x5d   : > { %458 = shalt.err (!%p455_p13)
}
  0x5e   : > { %337 = dma.vmem_to_hbm [thread:$0]  (%p576_p9), %s229_s22, 128, %s231_s23, %s213_s9  }
  0x5f PF: > { %s242_s2 = sand.u32 1, %s493_s6   ;;  %p344_p0 = pnand %p318_p12, %p583_p11 }
  0x60   : > { %s243_s3 = scalar_lea.sflag [#allocation4], %s242_s2 }
  0x61   : > { %p345_p1 = pneg %p344_p0 }
  0x63   : > { %488 = dma.done.wait (%p345_p1), %s243_s3, 128  }
  0x64   : > { %490 = vsyncadd (%p345_p1), %s243_s3, 4294967168  ;;  %s17_s11 = sadd.s32 1, %s513_s11   ;;  %s655_s6 = smov %s497_s7 }
  0x65   : > { %p14_p2 = scmp.ge.s32.totalorder %s17_s11, 4   ;;  %s656_s7 = smov %s501_s8 }
  0x66   : > { %s657_s8 = smov %s581_s20  ;;  %s658_s9 = smov %s509_s10 }
  0x67   : > { %s659_s10 = smov %s661_s14  ;;  %16 = sbr.rel (!%p14_p2) target bundleno = 6 (0x6), region = 69 }
  0x6c   :  { %249 = vsyncpa [#allocation3], 1 }
  0x6d   :  { %251 = vsyncpa [#allocation3 + $0x1], 1 }
  0x6e   :  { %252 = vsyncpa [#allocation4], 1 }
  0x6f   :  { %254 = vsyncpa [#allocation4 + $0x1], 1 }

</bundles_post_ra>
